<compile_context>
chip_gen: v7x
topology: tpu7x:2x2x1
jax: 0.10.0
libtpu: 0.0.40
codegen_flags: <defaults>
</compile_context>

<pallas_src>
import jax
import jax.numpy as jnp
from jax.experimental import pallas as pl
from jax.experimental.pallas import tpu as pltpu

IN_F = 28 * 28          # 784
OUT_F = 10
OUT_PAD = 128           # lane-dense output block (10 -> 128, sliced outside)
MAX_TB = 512            # batch-tile cap (>= 85% of HBM roofline, modest VMEM)


def _round_up(x, m):
    return (x + m - 1) // m * m


def _choose_tile(B):
    """Batch tile size. Small B: one tile rounded to 16 (bf16 sublane pack).
    Large B: multiple of 256, capped at MAX_TB, with >= 2 grid steps so the
    two TensorCores of a v7x chip both get work (no-op on v5e/v6e)."""
    if B <= 256:
        return _round_up(B, 16)
    return min(MAX_TB, _round_up((B + 1) // 2, 256))


def _mlp_kernel(x_ref,
                w1_ref, b1_ref,
                w2_ref, b2_ref,
                w3_ref, b3_ref,
                w4_ref, b4_ref,
                out_ref):
    """One batch tile of the whole MLP.
    x_ref: (TB, 784) f32 streamed tile; weights bf16, biases f32 (resident);
    out_ref: (TB, 128) bf16."""
    # bf16 cast happens here (VPU work hidden under the fc1 MXU pass) instead
    # of as a separate XLA pad/convert pass in the wrapper.
    x = x_ref[...].astype(jnp.bfloat16)                                  # (TB, 784)

    h = jnp.dot(x, w1_ref[...], preferred_element_type=jnp.float32)     # (TB, 128)
    h = jnp.maximum(h + b1_ref[...], 0.0).astype(jnp.bfloat16)

    h = jnp.dot(h, w2_ref[...], preferred_element_type=jnp.float32)     # (TB, 256)
    h = jnp.maximum(h + b2_ref[...], 0.0).astype(jnp.bfloat16)

    h = jnp.dot(h, w3_ref[...], preferred_element_type=jnp.float32)     # (TB, 128)
    h = jnp.maximum(h + b3_ref[...], 0.0).astype(jnp.bfloat16)

    h = jnp.dot(h, w4_ref[...], preferred_element_type=jnp.float32)     # (TB, 128)
    out_ref[...] = (h + b4_ref[...]).astype(out_ref.dtype)              # bf16 out


def prepare_params(params):
    """One-time param prep (NOT in the jitted forward path): bf16 weights,
    f32 biases, last layer padded 10 -> 128 lanes. Weights are (in, out)."""
    (w1, b1), (w2, b2), (w3, b3), (w4, b4) = params
    w4p = jnp.pad(w4, ((0, 0), (0, OUT_PAD - OUT_F)))
    b4p = jnp.pad(b4, ((0, 0), (0, OUT_PAD - OUT_F)))
    return (
        w1.astype(jnp.bfloat16), b1.astype(jnp.float32),
        w2.astype(jnp.bfloat16), b2.astype(jnp.float32),
        w3.astype(jnp.bfloat16), b3.astype(jnp.float32),
        w4p.astype(jnp.bfloat16), b4p.astype(jnp.float32),
    )


@jax.jit
def net_forward(x, prepped):
    """Equivalent of Net.forward. x: any shape flattening to (B, 784);
    prepped: output of prepare_params(). Returns (B, 10) f32."""
    w1, b1, w2, b2, w3, b3, w4, b4 = prepped

    x2d = x.reshape(-1, IN_F).astype(jnp.float32)
    B = x2d.shape[0]

    TB = _choose_tile(B)
    B_pad = _round_up(B, TB)
    if B_pad != B:
        # Tail rows compute relu(bias) garbage and are discarded below.
        x2d = jnp.pad(x2d, ((0, B_pad - B), (0, 0)))

    # Weights/biases: constant index_map -> fetched once, stay VMEM-resident.
    def resident(arr):
        return pl.BlockSpec(arr.shape, lambda i: (0, 0))

    out = pl.pallas_call(
        _mlp_kernel,
        out_shape=jax.ShapeDtypeStruct((B_pad, OUT_PAD), jnp.bfloat16),
        grid=(B_pad // TB,),
        in_specs=[
            # Streamed f32 x tiles; last dim 784 == full array dim (legal).
            pl.BlockSpec((TB, IN_F), lambda i: (i, 0)),
            resident(w1), resident(b1),
            resident(w2), resident(b2),
            resident(w3), resident(b3),
            resident(w4), resident(b4),
        ],
        out_specs=pl.BlockSpec((TB, OUT_PAD), lambda i: (i, 0)),
        compiler_params=pltpu.CompilerParams(
            dimension_semantics=("parallel",),
            vmem_limit_bytes=32 << 20,
        ),
    )(x2d, w1, b1, w2, b2, w3, b3, w4, b4)

    return out[:B, :OUT_F].astype(jnp.float32)


def init_params(key):
    """Deterministic init matching PyTorch nn.Linear default
    (uniform(-1/sqrt(fan_in), 1/sqrt(fan_in))). Weights stored as (in, out)."""
    dims = [(IN_F, 128), (128, 256), (256, 128), (128, OUT_F)]
    params = []
    for fan_in, fan_out in dims:
        key, kw, kb = jax.random.split(key, 3)
        bound = 1.0 / jnp.sqrt(jnp.float32(fan_in))
        w = jax.random.uniform(kw, (fan_in, fan_out), jnp.float32, -bound, bound)
        b = jax.random.uniform(kb, (1, fan_out), jnp.float32, -bound, bound)
        params.append((w, b))
    return tuple(params)


def _reference_forward(x, params):
    """Plain-JAX f32 reference (matches the PyTorch module)."""
    h = x.reshape(-1, IN_F).astype(jnp.float32)
    (w1, b1), (w2, b2), (w3, b3), (w4, b4) = params
    h = jnp.maximum(h @ w1 + b1, 0.0)
    h = jnp.maximum(h @ w2 + b2, 0.0)
    h = jnp.maximum(h @ w3 + b3, 0.0)
    return h @ w4 + b4


if __name__ == "__main__":
    key = jax.random.PRNGKey(0)
    kx, kp = jax.random.split(key)

    # MNIST-like NCHW input: batch=8, 1 channel, 28x28
    x = jax.random.normal(kx, (8, 1, 28, 28), jnp.float32)
    params = init_params(kp)
    prepped = prepare_params(params)     # one-time, outside the jitted forward

    out = net_forward(x, prepped)
    out = jax.block_until_ready(out)

    ref = _reference_forward(x, params)
    assert out.shape == (8, 10), out.shape
    # bf16 operands/activations -> loosened tolerance vs f32 reference.
    assert jnp.allclose(out, ref, atol=5e-2, rtol=5e-2), (
        "mismatch vs JAX reference: max abs diff "
        f"{jnp.max(jnp.abs(out - ref)):.4e}")

    print("KERNEL_OK")
</pallas_src>

<mosaic_0001>
module attributes {stable_mosaic.version = 11 : i64} {
  func.func @_mlp_kernel(%arg0: i32, %arg1: memref<16x784xf32, #tpu.memory_space<vmem>>, %arg2: memref<784x128xbf16, #tpu.memory_space<vmem>>, %arg3: memref<1x128xf32, #tpu.memory_space<vmem>>, %arg4: memref<128x256xbf16, #tpu.memory_space<vmem>>, %arg5: memref<1x256xf32, #tpu.memory_space<vmem>>, %arg6: memref<256x128xbf16, #tpu.memory_space<vmem>>, %arg7: memref<1x128xf32, #tpu.memory_space<vmem>>, %arg8: memref<128x128xbf16, #tpu.memory_space<vmem>>, %arg9: memref<1x128xf32, #tpu.memory_space<vmem>>, %arg10: memref<16x128xbf16, #tpu.memory_space<vmem>>) attributes {dimension_semantics = [#tpu.dimension_semantics<parallel>], iteration_bounds = array<i64: 1>, scalar_prefetch = 0 : i64, scratch_operands = 0 : i64, tpu.core_type = #tpu.core_type<tc>, window_params = [{transform_indices = @transform_0, window_bounds = array<i64: 16, 784>}, {pipeline_mode = #tpu.pipeline_mode<synchronous>, transform_indices = @transform_1, window_bounds = array<i64: 784, 128>}, {pipeline_mode = #tpu.pipeline_mode<synchronous>, transform_indices = @transform_2, window_bounds = array<i64: 1, 128>}, {pipeline_mode = #tpu.pipeline_mode<synchronous>, transform_indices = @transform_3, window_bounds = array<i64: 128, 256>}, {pipeline_mode = #tpu.pipeline_mode<synchronous>, transform_indices = @transform_4, window_bounds = array<i64: 1, 256>}, {pipeline_mode = #tpu.pipeline_mode<synchronous>, transform_indices = @transform_5, window_bounds = array<i64: 256, 128>}, {pipeline_mode = #tpu.pipeline_mode<synchronous>, transform_indices = @transform_6, window_bounds = array<i64: 1, 128>}, {pipeline_mode = #tpu.pipeline_mode<synchronous>, transform_indices = @transform_7, window_bounds = array<i64: 128, 128>}, {pipeline_mode = #tpu.pipeline_mode<synchronous>, transform_indices = @transform_8, window_bounds = array<i64: 1, 128>}, {transform_indices = @transform_9, window_bounds = array<i64: 16, 128>}]} {
    %c0 = arith.constant 0 : index
    %c0_0 = arith.constant 0 : index
    %0 = vector.load %arg1[%c0, %c0_0] : memref<16x784xf32, #tpu.memory_space<vmem>>, vector<16x784xf32>
    %1 = arith.truncf %0 : vector<16x784xf32> to vector<16x784xbf16>
    %c0_1 = arith.constant 0 : index
    %c0_2 = arith.constant 0 : index
    %2 = vector.load %arg2[%c0_1, %c0_2] : memref<784x128xbf16, #tpu.memory_space<vmem>>, vector<784x128xbf16>
    %cst = arith.constant dense<0.000000e+00> : vector<16x128xf32>
    %3 = tpu.matmul %1, %2, %cst {dimension_numbers = #tpu.dot_dimension_numbers<[1], [0], [0], [1], [0, 0, 1, 1], [], []>} : vector<16x784xbf16>, vector<784x128xbf16>, vector<16x128xf32> -> vector<16x128xf32>
    %c0_3 = arith.constant 0 : index
    %c0_4 = arith.constant 0 : index
    %4 = vector.load %arg3[%c0_3, %c0_4] : memref<1x128xf32, #tpu.memory_space<vmem>>, vector<1x128xf32>
    %5 = vector.broadcast %4 : vector<1x128xf32> to vector<16x128xf32>
    %6 = arith.addf %3, %5 : vector<16x128xf32>
    %cst_5 = arith.constant 0.000000e+00 : f32
    %7 = vector.broadcast %cst_5 : f32 to vector<16x128xf32>
    %8 = arith.maximumf %6, %7 : vector<16x128xf32>
    %9 = arith.truncf %8 : vector<16x128xf32> to vector<16x128xbf16>
    %c0_6 = arith.constant 0 : index
    %c0_7 = arith.constant 0 : index
    %10 = vector.load %arg4[%c0_6, %c0_7] : memref<128x256xbf16, #tpu.memory_space<vmem>>, vector<128x256xbf16>
    %cst_8 = arith.constant dense<0.000000e+00> : vector<16x256xf32>
    %11 = tpu.matmul %9, %10, %cst_8 {dimension_numbers = #tpu.dot_dimension_numbers<[1], [0], [0], [1], [0, 0, 1, 1], [], []>} : vector<16x128xbf16>, vector<128x256xbf16>, vector<16x256xf32> -> vector<16x256xf32>
    %c0_9 = arith.constant 0 : index
    %c0_10 = arith.constant 0 : index
    %12 = vector.load %arg5[%c0_9, %c0_10] : memref<1x256xf32, #tpu.memory_space<vmem>>, vector<1x256xf32>
    %13 = vector.broadcast %12 : vector<1x256xf32> to vector<16x256xf32>
    %14 = arith.addf %11, %13 : vector<16x256xf32>
    %cst_11 = arith.constant 0.000000e+00 : f32
    %15 = vector.broadcast %cst_11 : f32 to vector<16x256xf32>
    %16 = arith.maximumf %14, %15 : vector<16x256xf32>
    %17 = arith.truncf %16 : vector<16x256xf32> to vector<16x256xbf16>
    %c0_12 = arith.constant 0 : index
    %c0_13 = arith.constant 0 : index
    %18 = vector.load %arg6[%c0_12, %c0_13] : memref<256x128xbf16, #tpu.memory_space<vmem>>, vector<256x128xbf16>
    %cst_14 = arith.constant dense<0.000000e+00> : vector<16x128xf32>
    %19 = tpu.matmul %17, %18, %cst_14 {dimension_numbers = #tpu.dot_dimension_numbers<[1], [0], [0], [1], [0, 0, 1, 1], [], []>} : vector<16x256xbf16>, vector<256x128xbf16>, vector<16x128xf32> -> vector<16x128xf32>
    %c0_15 = arith.constant 0 : index
    %c0_16 = arith.constant 0 : index
    %20 = vector.load %arg7[%c0_15, %c0_16] : memref<1x128xf32, #tpu.memory_space<vmem>>, vector<1x128xf32>
    %21 = vector.broadcast %20 : vector<1x128xf32> to vector<16x128xf32>
    %22 = arith.addf %19, %21 : vector<16x128xf32>
    %cst_17 = arith.constant 0.000000e+00 : f32
    %23 = vector.broadcast %cst_17 : f32 to vector<16x128xf32>
    %24 = arith.maximumf %22, %23 : vector<16x128xf32>
    %25 = arith.truncf %24 : vector<16x128xf32> to vector<16x128xbf16>
    %c0_18 = arith.constant 0 : index
    %c0_19 = arith.constant 0 : index
    %26 = vector.load %arg8[%c0_18, %c0_19] : memref<128x128xbf16, #tpu.memory_space<vmem>>, vector<128x128xbf16>
    %cst_20 = arith.constant dense<0.000000e+00> : vector<16x128xf32>
    %27 = tpu.matmul %25, %26, %cst_20 {dimension_numbers = #tpu.dot_dimension_numbers<[1], [0], [0], [1], [0, 0, 1, 1], [], []>} : vector<16x128xbf16>, vector<128x128xbf16>, vector<16x128xf32> -> vector<16x128xf32>
    %c0_21 = arith.constant 0 : index
    %c0_22 = arith.constant 0 : index
    %28 = vector.load %arg9[%c0_21, %c0_22] : memref<1x128xf32, #tpu.memory_space<vmem>>, vector<1x128xf32>
    %29 = vector.broadcast %28 : vector<1x128xf32> to vector<16x128xf32>
    %30 = arith.addf %27, %29 : vector<16x128xf32>
    %31 = arith.truncf %30 : vector<16x128xf32> to vector<16x128xbf16>
    %c0_23 = arith.constant 0 : index
    %c0_24 = arith.constant 0 : index
    %32 = vector.load %arg10[%c0_23, %c0_24] : memref<16x128xbf16, #tpu.memory_space<vmem>>, vector<16x128xbf16>
    tpu.vector_store %arg10[%c0_23, %c0_24], %31 {strides = array<i32>} : memref<16x128xbf16, #tpu.memory_space<vmem>>, vector<16x128xbf16>,
    return
  }
  func.func @transform_0(%arg0: i32) -> (i32, i32) {
    %c0_i32 = arith.constant 0 : i32
    %c0_i32_0 = arith.constant 0 : i32
    return %arg0, %c0_i32 : i32, i32
  }
  func.func @transform_1(%arg0: i32) -> (i32, i32) {
    %c0_i32 = arith.constant 0 : i32
    %c0_i32_0 = arith.constant 0 : i32
    %c0_i32_1 = arith.constant 0 : i32
    return %c0_i32, %c0_i32_0 : i32, i32
  }
  func.func @transform_2(%arg0: i32) -> (i32, i32) {
    %c0_i32 = arith.constant 0 : i32
    %c0_i32_0 = arith.constant 0 : i32
    %c0_i32_1 = arith.constant 0 : i32
    return %c0_i32, %c0_i32_0 : i32, i32
  }
  func.func @transform_3(%arg0: i32) -> (i32, i32) {
    %c0_i32 = arith.constant 0 : i32
    %c0_i32_0 = arith.constant 0 : i32
    %c0_i32_1 = arith.constant 0 : i32
    return %c0_i32, %c0_i32_0 : i32, i32
  }
  func.func @transform_4(%arg0: i32) -> (i32, i32) {
    %c0_i32 = arith.constant 0 : i32
    %c0_i32_0 = arith.constant 0 : i32
    %c0_i32_1 = arith.constant 0 : i32
    return %c0_i32, %c0_i32_0 : i32, i32
  }
  func.func @transform_5(%arg0: i32) -> (i32, i32) {
    %c0_i32 = arith.constant 0 : i32
    %c0_i32_0 = arith.constant 0 : i32
    %c0_i32_1 = arith.constant 0 : i32
    return %c0_i32, %c0_i32_0 : i32, i32
  }
  func.func @transform_6(%arg0: i32) -> (i32, i32) {
    %c0_i32 = arith.constant 0 : i32
    %c0_i32_0 = arith.constant 0 : i32
    %c0_i32_1 = arith.constant 0 : i32
    return %c0_i32, %c0_i32_0 : i32, i32
  }
  func.func @transform_7(%arg0: i32) -> (i32, i32) {
    %c0_i32 = arith.constant 0 : i32
    %c0_i32_0 = arith.constant 0 : i32
    %c0_i32_1 = arith.constant 0 : i32
    return %c0_i32, %c0_i32_0 : i32, i32
  }
  func.func @transform_8(%arg0: i32) -> (i32, i32) {
    %c0_i32 = arith.constant 0 : i32
    %c0_i32_0 = arith.constant 0 : i32
    %c0_i32_1 = arith.constant 0 : i32
    return %c0_i32, %c0_i32_0 : i32, i32
  }
  func.func @transform_9(%arg0: i32) -> (i32, i32) {
    %c0_i32 = arith.constant 0 : i32
    %c0_i32_0 = arith.constant 0 : i32
    return %arg0, %c0_i32 : i32, i32
  }
}

</mosaic_0001>

<bundles_post_ra>
// kernel: net_forward.1
= control target key start
LH: loop header
LB: loop body
LE: loop exit
PB: predicated region body
PF: predicated region fallthrough
CT: control target
= control target key end

     0   :  { %v1413_v43 = vmov 0.0   ;;  %vm1414_vm0 = vmmov 0   ;;  %vm453_vm1 = vcmask 130048   ;;  %s1803_s1 = inlined_call_operand.vmem [shape: bf16[784,128], index: 1, kind: input, shape index: {}]   ;;  %s1804_s0 = inlined_call_operand.vmem [shape: f32[16,784], index: 0, kind: input, shape index: {}]   ;;  %s1805_s3 = inlined_call_operand.vmem [shape: bf16[128,256], index: 3, kind: input, shape index: {}]   ;;  %s1806_s5 = inlined_call_operand.vmem [shape: bf16[256,128], index: 5, kind: input, shape index: {}]   ;;  %s1807_s2 = inlined_call_operand.vmem [shape: f32[1,128], index: 2, kind: input, shape index: {}]   ;;  %s1808_s7 = inlined_call_operand.vmem [shape: bf16[128,128], index: 7, kind: input, shape index: {}]   ;;  %s1809_s4 = inlined_call_operand.vmem [shape: f32[1,256], index: 4, kind: input, shape index: {}]   ;;  %s1810_s6 = inlined_call_operand.vmem [shape: f32[1,128], index: 6, kind: input, shape index: {}]   ;;  %s1811_s8 = inlined_call_operand.vmem [shape: f32[1,128], index: 8, kind: input, shape index: {}]   ;;  %s1812_s9 = inlined_call_operand.vmem [shape: bf16[16,128], index: 9, kind: output, shape index: {}]  }
   0x1   :  { %v1316_v0 = vld [vmem:[%s1803_s1 + $0x40] sm:$0xff]   ;;  %v1320_v4 = vld [vmem:[%s1803_s1 + $0x48] sm:$0xff]   ;;  %v1324_v8 = vld [vmem:[%s1803_s1 + $0x50] sm:$0xff]  }
   0x2   :  { %v1317_v1 = vld [vmem:[%s1803_s1] sm:$0xff]   ;;  %1188 = vmatprep.subr.bf16.mxu0 %v1316_v0  ;;  %v1321_v5 = vld [vmem:[%s1803_s1 + $0x8] sm:$0xff]   ;;  %v1325_v9 = vld [vmem:[%s1803_s1 + $0x10] sm:$0xff]  }
   0x3   :  { %v1318_v2 = vld [vmem:[%s1803_s1 + $0xc0] sm:$0xff]   ;;  %1189 = vmatpush3.bf16.msra.mxu0 %v1317_v1  ;;  %v1322_v6 = vld [vmem:[%s1803_s1 + $0xc8] sm:$0xff]   ;;  %v1326_v10 = vld [vmem:[%s1803_s1 + $0xd0] sm:$0xff]  }
   0x4   :  { %v1319_v3 = vld [vmem:[%s1803_s1 + $0x80] sm:$0xff]   ;;  %1210 = vmatprep.subr.bf16.mxu1 %v1318_v2  ;;  %1190 = vmatprep.subr.bf16.mxu0 %v1320_v4  ;;  %v1323_v7 = vld [vmem:[%s1803_s1 + $0x88] sm:$0xff]   ;;  %v1327_v11 = vld [vmem:[%s1803_s1 + $0x90] sm:$0xff]  }
   0x5   :  { %1211 = vmatpush3.bf16.msra.mxu1 %v1319_v3  ;;  %v1328_v12 = vld [vmem:[%s1803_s1 + $0x58] sm:$0xff]   ;;  %v1332_v16 = vld [vmem:[%s1803_s1 + $0x60] sm:$0xff]   ;;  %v1336_v20 = vld [vmem:[%s1803_s1 + $0x68] sm:$0xff]  }
   0x6   :  { %1212 = vmatprep.subr.bf16.mxu1 %v1322_v6  ;;  %v1329_v13 = vld [vmem:[%s1803_s1 + $0x18] sm:$0xff]   ;;  %v1333_v17 = vld [vmem:[%s1803_s1 + $0x20] sm:$0xff]   ;;  %v1337_v21 = vld [vmem:[%s1803_s1 + $0x28] sm:$0xff]  }
   0x7   :  { %1191 = vmatpush3.bf16.msra.mxu0 %v1321_v5  ;;  %v1330_v14 = vld [vmem:[%s1803_s1 + $0xd8] sm:$0xff]   ;;  %v1334_v18 = vld [vmem:[%s1803_s1 + $0xe0] sm:$0xff]   ;;  %v1338_v22 = vld [vmem:[%s1803_s1 + $0xe8] sm:$0xff]  }
   0x8   :  { %1192 = vmatprep.subr.bf16.mxu0 %v1324_v8  ;;  %v1331_v15 = vld [vmem:[%s1803_s1 + $0x98] sm:$0xff]   ;;  %v1335_v19 = vld [vmem:[%s1803_s1 + $0xa0] sm:$0xff]   ;;  %v1339_v23 = vld [vmem:[%s1803_s1 + $0xa8] sm:$0xff]  }
   0x9   :  { %1213 = vmatpush3.bf16.msra.mxu1 %v1323_v7  ;;  %v1340_v24 = vld [vmem:[%s1803_s1 + $0x70] sm:$0xff]   ;;  %v1344_v28 = vld [vmem:[%s1803_s1 + $0x78] sm:$0xff]   ;;  %v34_v31 = vld [vmem:[%s1804_s0 + $0x8] sm:$0xff] }
   0xa   :  { %1214 = vmatprep.subr.bf16.mxu1 %v1326_v10  ;;  %v1341_v25 = vld [vmem:[%s1803_s1 + $0x30] sm:$0xff]   ;;  %v1345_v29 = vld [vmem:[%s1803_s1 + $0x38] sm:$0xff]   ;;  %v41_v32 = vld [vmem:[%s1804_s0 + $0x40] sm:$0xff] }
   0xb   :  { %1193 = vmatpush3.bf16.msra.mxu0 %v1325_v9  ;;  %v1342_v26 = vld [vmem:[%s1803_s1 + $0xf0] sm:$0xff]   ;;  %v1346_v30 = vld [vmem:[%s1803_s1 + $0xf8] sm:$0xff]   ;;  %v48_v33 = vpack.c.bf16 %v41_v32, %v34_v31  ;;  %v33_v35 = vld [vmem:[%s1804_s0] sm:$0xff] }
   0xc   :  { %1194 = vmatprep.subr.bf16.mxu0 %v1328_v12  ;;  %v1343_v27 = vld [vmem:[%s1803_s1 + $0xb0] sm:$0xff]   ;;  %v1347_v34 = vld [vmem:[%s1803_s1 + $0xb8] sm:$0xff]   ;;  %v1348_v38 = vld [vmem:[%s1803_s1 + $0x140] sm:$0xff]  }
   0xd   :  { %1215 = vmatpush3.bf16.msra.mxu1 %v1327_v11  ;;  %v40_v36 = vld [vmem:[%s1804_s0 + $0x38] sm:$0xff]  ;;  %489 = vmatprep.mubr.bf16.mxu0 %v48_v33  ;;  %v43_v40 = vld [vmem:[%s1804_s0 + $0x50] sm:$0xff]  ;;  %v1349_v42 = vld [vmem:[%s1803_s1 + $0x100] sm:$0xff]  }
   0xe   :  { %1216 = vmatprep.subr.bf16.mxu1 %v1330_v14  ;;  %v47_v37 = vpack.c.bf16 %v40_v36, %v33_v35  ;;  %v36_v39 = vld [vmem:[%s1804_s0 + $0x18] sm:$0xff]  ;;  %v35_v44 = vld [vmem:[%s1804_s0 + $0x10] sm:$0xff]  ;;  %v42_v45 = vld [vmem:[%s1804_s0 + $0x48] sm:$0xff] }
   0xf   :  { %1195 = vmatpush3.bf16.msra.mxu0 %v1329_v13  ;;  %v50_v41 = vpack.c.bf16 %v43_v40, %v36_v39  ;;  %v49_v46 = vpack.c.bf16 %v42_v45, %v35_v44  ;;  %v1350_v47 = vld [vmem:[%s1803_s1 + $0x148] sm:$0xff]   ;;  %v1352_v49 = vld [vmem:[%s1803_s1 + $0x150] sm:$0xff]   ;;  %v1354_v51 = vld [vmem:[%s1803_s1 + $0x158] sm:$0xff]  }
  0x10   :  { %1196 = vmatprep.subr.bf16.mxu0 %v1332_v16  ;;  %v1351_v48 = vld [vmem:[%s1803_s1 + $0x108] sm:$0xff]   ;;  %v1353_v50 = vld [vmem:[%s1803_s1 + $0x110] sm:$0xff]   ;;  %v1355_v52 = vld [vmem:[%s1803_s1 + $0x118] sm:$0xff]  }
  0x11   :  { %1217 = vmatpush3.bf16.msra.mxu1 %v1331_v15  ;;  %530 = vmatprep.mubr.bf16.mxu1 %v50_v41  ;;  %v1356_v53 = vld [vmem:[%s1803_s1 + $0x160] sm:$0xff]   ;;  %v1358_v55 = vld [vmem:[%s1803_s1 + $0x168] sm:$0xff]   ;;  %v39_v61 = vld [vmem:[%s1804_s0 + $0x30] sm:$0xff] }
  0x12   :  { %1218 = vmatprep.subr.bf16.mxu1 %v1334_v18  ;;  %v1357_v54 = vld [vmem:[%s1803_s1 + $0x120] sm:$0xff]   ;;  %v38_v57 = vld [vmem:[%s1804_s0 + $0x28] sm:$0xff]  ;;  %v1360_v63 = vld [vmem:[%s1803_s1 + $0x170] sm:$0xff]  }
  0x13   :  { %1197 = vmatpush3.bf16.msra.mxu0 %v1333_v17  ;;  %v1364_v56 = vld [vmem:[%s1803_s1 + $0x180] sm:$0xff]   ;;  %v1359_v59 = vld [vmem:[%s1803_s1 + $0x128] sm:$0xff]   ;;  %v1361_v1 = vld [vmem:[%s1803_s1 + $0x130] sm:$0xff]  }
  0x14   :  { %1198 = vmatprep.subr.bf16.mxu0 %v1336_v20  ;;  %v45_v58 = vld [vmem:[%s1804_s0 + $0x60] sm:$0xff]  ;;  %v46_v62 = vld [vmem:[%s1804_s0 + $0x68] sm:$0xff]  ;;  %v1362_v2 = vld [vmem:[%s1803_s1 + $0x178] sm:$0xff]  }
  0x15   :  { %1219 = vmatpush3.bf16.msra.mxu1 %v1335_v19  ;;  %v52_v60 = vpack.c.bf16 %v45_v58, %v38_v57  ;;  %v53_v0 = vpack.c.bf16 %v46_v62, %v39_v61  ;;  %v1363_v3 = vld [vmem:[%s1803_s1 + $0x138] sm:$0xff]   ;;  %v37_v4 = vld [vmem:[%s1804_s0 + $0x20] sm:$0xff] }
  0x16   :  { %1220 = vmatprep.subr.bf16.mxu1 %v1338_v22  ;;  %v44_v5 = vld [vmem:[%s1804_s0 + $0x58] sm:$0xff]  ;;  %v1365_v7 = vld [vmem:[%s1805_s3] ss:$8 sps:$4 sm:$0xff]   ;;  %v1367_v8 = vld [vmem:[%s1805_s3 + $0x4] ss:$8 sps:$4 sm:$0xff]  }
  0x17   :  { %1199 = vmatpush3.bf16.msra.mxu0 %v1337_v21  ;;  %v51_v6 = vpack.c.bf16 %v44_v5, %v37_v4  ;;  %v1370_v9 = vld [vmem:[%s1805_s3 + $0x14] ss:$8 sps:$4 sm:$0xff]   ;;  %v1368_v10 = vld [vmem:[%s1805_s3 + $0x10] ss:$8 sps:$4 sm:$0xff]   ;;  %v1373_v11 = vld [vmem:[%s1805_s3 + $0x24] ss:$8 sps:$4 sm:$0xff]  }
  0x18   :  { %1200 = vmatprep.subr.bf16.mxu0 %v1340_v24  ;;  %v1371_v12 = vld [vmem:[%s1805_s3 + $0x20] ss:$8 sps:$4 sm:$0xff]   ;;  %v1376_v13 = vld [vmem:[%s1805_s3 + $0x34] ss:$8 sps:$4 sm:$0xff]   ;;  %v1374_v14 = vld [vmem:[%s1805_s3 + $0x30] ss:$8 sps:$4 sm:$0xff]  }
  0x19   :  { %1221 = vmatpush3.bf16.msra.mxu1 %v1339_v23  ;;  %v1379_v15 = vld [vmem:[%s1805_s3 + $0x44] ss:$8 sps:$4 sm:$0xff]   ;;  %v1377_v16 = vld [vmem:[%s1805_s3 + $0x40] ss:$8 sps:$4 sm:$0xff]   ;;  %v1382_v17 = vld [vmem:[%s1805_s3 + $0x54] ss:$8 sps:$4 sm:$0xff]  }
  0x1a   :  { %1222 = vmatprep.subr.bf16.mxu1 %v1342_v26  ;;  %v1380_v18 = vld [vmem:[%s1805_s3 + $0x50] ss:$8 sps:$4 sm:$0xff]   ;;  %v1385_v19 = vld [vmem:[%s1805_s3 + $0x64] ss:$8 sps:$4 sm:$0xff]   ;;  %v1383_v20 = vld [vmem:[%s1805_s3 + $0x60] ss:$8 sps:$4 sm:$0xff]  }
  0x1b   :  { %1201 = vmatpush3.bf16.msra.mxu0 %v1341_v25  ;;  %v1388_v21 = vld [vmem:[%s1805_s3 + $0x74] ss:$8 sps:$4 sm:$0xff]   ;;  %v1386_v22 = vld [vmem:[%s1805_s3 + $0x70] ss:$8 sps:$4 sm:$0xff]   ;;  %v1415_v23 = vmov 0   ;;  %v1389_v24 = vld [vmem:[%s1806_s5 + $0x40] sm:$0xff]  }
  0x1c   :  { %1202 = vmatprep.subr.bf16.mxu0 %v1344_v28  ;;  %v1390_v25 = vld [vmem:[%s1806_s5] sm:$0xff]   ;;  %v1391_v26 = vld [vmem:[%s1806_s5 + $0x48] sm:$0xff]   ;;  %v1393_v28 = vld [vmem:[%s1806_s5 + $0x50] sm:$0xff]  }
  0x1d   :  { %1223 = vmatpush3.bf16.msra.mxu1 %v1343_v27  ;;  %v1392_v27 = vld [vmem:[%s1806_s5 + $0x8] sm:$0xff]   ;;  %v1396_v31 = vld [vmem:[%s1806_s5 + $0x18] sm:$0xff]   ;;  %v1397_v32 = vld [vmem:[%s1806_s5 + $0x60] sm:$0xff]  }
  0x1e   :  { %1224 = vmatprep.subr.bf16.mxu1 %v1346_v30  ;;  %v1395_v30 = vld [vmem:[%s1806_s5 + $0x58] sm:$0xff]   ;;  %v1398_v33 = vld [vmem:[%s1806_s5 + $0x20] sm:$0xff]  }
  0x1f   :  { %1203 = vmatpush3.bf16.msra.mxu0 %v1345_v29  ;;  %v1394_v29 = vld [vmem:[%s1806_s5 + $0x10] sm:$0xff]   ;;  %v1086_v36 = vld [vmem:[%s1807_s2] ss:$0 sm:$0xff] }
  0x20   :  { %1232 = vmatprep.subr.bf16.mxu0 %v1348_v38 }
  0x21   :  { %1225 = vmatpush3.bf16.msra.mxu1 %v1347_v34  ;;  %v1399_v34 = vld [vmem:[%s1806_s5 + $0x68] sm:$0xff]  }
  0x22   :  { %1287 = vmatprep.subr.bf16.mxu1 %v1413_v43  ;;  %490 = vmatmul.mubr.bf16.vlgmr.msra.gmra.mrb[0].mxu0 %v47_v37 }
  0x23   :  { %1233 = vmatpush3.bf16.msra.mxu0 %v1349_v42  ;;  %571 = vmatprep.mubr.bf16.mxu0 %v52_v60 }
  0x24   :  { %531 = vmatmul.mubr.bf16.vlgmr.msra.gmra.mrb[0].mxu1 %v49_v46  ;;  %1234 = vmatprep.subr.bf16.mxu0 %v1350_v47 }
  0x25   :  { %1289 = vmatprep.mubr.msk.bf16.mxu1 %vm1414_vm0, %v1413_v43  ;;  %1288 = vmatpush3.bf16.msra.mxu1 %v1364_v56 }
  0x26   :  { %732 = vmatprep.subr.bf16.mxu1 %v1367_v8  ;;  %v1402_v8 = vld [vmem:[%s1806_s5 + $0x30] sm:$0xff]  }
  0x27   :  { %1235 = vmatpush3.bf16.msra.mxu0 %v1351_v48 }
  0x28   :  { %1236 = vmatprep.subr.bf16.mxu0 %v1352_v49 }
  0x2b   :  { %1237 = vmatpush3.bf16.msra.mxu0 %v1353_v50 }
  0x2c   :  { %1238 = vmatprep.subr.bf16.mxu0 %v1354_v51  ;;  %1290 = vmatmul.mubr.msk.bf16.vlgmr.msra.gmra.mrb[4].mxu1 %vm453_vm1, %v53_v0 }
  0x2d   :  { %733 = vmatpush1.bf16.msra.mxu1 %v1365_v7  ;;  %764 = vmatprep.mubr.bf16.mxu1 %v1415_v23  ;;  %v1401_v7 = vld [vmem:[%s1806_s5 + $0x70] sm:$0xff]  }
  0x2e   :  { %734 = vmatprep.subr.bf16.mxu1 %v1370_v9  ;;  %v1403_v9 = vld [vmem:[%s1806_s5 + $0x78] sm:$0xff]  }
  0x2f   :  { %1239 = vmatpush3.bf16.msra.mxu0 %v1355_v52 }
  0x30   :  { %1240 = vmatprep.subr.bf16.mxu0 %v1356_v53 }
  0x31   :  { %735 = vmatpush1.bf16.msra.mxu1 %v1368_v10  ;;  %v1404_v10 = vld [vmem:[%s1806_s5 + $0x38] sm:$0xff]  }
  0x32   :  { %736 = vmatprep.subr.bf16.mxu1 %v1373_v11  ;;  %v1405_v11 = vld [vmem:[%s1808_s7] sm:$0xff]  }
  0x33   :  { %1241 = vmatpush3.bf16.msra.mxu0 %v1357_v54 }
  0x34   :  { %1242 = vmatprep.subr.bf16.mxu0 %v1358_v55 }
  0x35   :  { %737 = vmatpush1.bf16.msra.mxu1 %v1371_v12  ;;  %v1406_v12 = vld [vmem:[%s1808_s7 + $0x8] sm:$0xff]  }
  0x36   :  { %738 = vmatprep.subr.bf16.mxu1 %v1376_v13  ;;  %v1407_v13 = vld [vmem:[%s1808_s7 + $0x10] sm:$0xff]  }
  0x37   :  { %1243 = vmatpush3.bf16.msra.mxu0 %v1359_v59 }
  0x38   :  { %1244 = vmatprep.subr.bf16.mxu0 %v1360_v63 }
  0x39   :  { %739 = vmatpush1.bf16.msra.mxu1 %v1374_v14  ;;  %v1408_v14 = vld [vmem:[%s1808_s7 + $0x18] sm:$0xff]  }
  0x3a   :  { %740 = vmatprep.subr.bf16.mxu1 %v1379_v15  ;;  %v1409_v15 = vld [vmem:[%s1808_s7 + $0x20] sm:$0xff]  }
  0x3b   :  { %1245 = vmatpush3.bf16.msra.mxu0 %v1361_v1 }
  0x3c   :  { %1246 = vmatprep.subr.bf16.mxu0 %v1362_v2 }
  0x3d   :  { %741 = vmatpush1.bf16.msra.mxu1 %v1377_v16  ;;  %v642_v16 = vlaneseq }
  0x3e   :  { %742 = vmatprep.subr.bf16.mxu1 %v1382_v17 }
  0x3f   :  { %1247 = vmatpush3.bf16.msra.mxu0 %v1363_v3  ;;  %v643_v17 = vshrl.u32 %v642_v16, 7 }
  0x40   :  { %1256 = vmatprep.subr.bf16.mxu0 %v1389_v24 }
  0x41   :  { %743 = vmatpush1.bf16.msra.mxu1 %v1380_v18  ;;  %v644_v18 = vsub.s32 0, %v643_v17 }
  0x42   :  { %572 = vmatmul.mubr.bf16.vlgmr.msra.gmra.mrb[4].mxu0 %v51_v6  ;;  %744 = vmatprep.subr.bf16.mxu1 %v1385_v19  ;;  %v1400_v6 = vld [vmem:[%s1806_s5 + $0x28] sm:$0xff]   ;;  %v640_v19 = vld [vmem:[%s1809_s4] sm:$0x3] }
  0x43   :  { %1257 = vmatpush3.bf16.msra.mxu0 %v1390_v25 }
  0x44   :  { %1258 = vmatprep.subr.bf16.mxu0 %v1391_v26 }
  0x45   :  { %745 = vmatpush1.bf16.msra.mxu1 %v1383_v20  ;;  %v648_v20 = vsub.s32 1, %v643_v17 }
  0x46   :  { %746 = vmatprep.subr.bf16.mxu1 %v1388_v21  ;;  %v645_v21 = vrot.slane %v640_v19, %v644_v18 }
  0x47   :  { %1259 = vmatpush3.bf16.msra.mxu0 %v1392_v27 }
  0x48   :  { %1260 = vmatprep.subr.bf16.mxu0 %v1393_v28 }
  0x49   :  { %747 = vmatpush1.bf16.msra.mxu1 %v1386_v22  ;;  %v649_v22 = vrot.slane %v640_v19, %v648_v20 }
  0x4a   :  { %1293 = vmatprep.subr.bf16.mxu1 %v1413_v43 }
  0x4b   :  { %1261 = vmatpush3.bf16.msra.mxu0 %v1394_v29 }
  0x4c   :  { %1262 = vmatprep.subr.bf16.mxu0 %v1395_v30 }
  0x4f   :  { %1263 = vmatpush3.bf16.msra.mxu0 %v1396_v31 }
  0x50   :  { %1264 = vmatprep.subr.bf16.mxu0 %v1397_v32 }
  0x53   :  { %1265 = vmatpush3.bf16.msra.mxu0 %v1398_v33 }
  0x54   :  { %1266 = vmatprep.subr.bf16.mxu0 %v1399_v34 }
  0x57   :  { %1267 = vmatpush3.bf16.msra.mxu0 %v1400_v6 }
  0x58   :  { %1268 = vmatprep.subr.bf16.mxu0 %v1401_v7 }
  0x5b   :  { %1269 = vmatpush3.bf16.msra.mxu0 %v1402_v8 }
  0x5c   :  { %1270 = vmatprep.subr.bf16.mxu0 %v1403_v9 }
  0x5f   :  { %1271 = vmatpush3.bf16.msra.mxu0 %v1404_v10 }
  0xf5   :  { %v1204_v35 = vpop.f32.mrb[0].mxu0 }
  0xf6   :  { %v1205_v37 = vpop.f32.mrb[1].mxu0 }
  0xf7   :  { %v1206_v38 = vadd.f32 %v1205_v37, %v1204_v35  ;;  %v1207_v39 = vpop.f32.mrb[2].mxu0  ;;  %v1226_v40 = vpop.f32.mrb[0].mxu1  ;;  %v1410_v37 = vld [vmem:[%s1808_s7 + $0x28] sm:$0xff]  }
  0xf8   :  { %v1208_v41 = vpop.f32.mrb[3].mxu0  ;;  %v1227_v45 = vpop.f32.mrb[1].mxu1 }
  0xf9   :  { %v492_v42 = vadd.f32 %v1206_v38, %v1086_v36  ;;  %v1209_v44 = vadd.f32 %v1208_v41, %v1207_v39  ;;  %v1228_v46 = vadd.f32 %v1227_v45, %v1226_v40  ;;  %v1229_v47 = vpop.f32.mrb[2].mxu1  ;;  %v1411_v38 = vld [vmem:[%s1808_s7 + $0x30] sm:$0xff]   ;;  %v1412_v39 = vld [vmem:[%s1808_s7 + $0x38] sm:$0xff]   ;;  %v1153_v41 = vld [vmem:[%s1810_s6] ss:$0 sm:$0xff] }
  0xfa   :  { %v1230_v49 = vpop.f32.mrb[3].mxu1 }
  0xfb   :  { %v495_v48 = vadd.f32 %v1209_v44, %v1086_v36  ;;  %v533_v50 = vadd.f32 %v1228_v46, %v492_v42  ;;  %v1231_v51 = vadd.f32 %v1230_v49, %v1229_v47 }
  0xfd   :  { %v536_v52 = vadd.f32 %v1231_v51, %v495_v48 }
  0xff   :  { %v614_v53 = vpop.f32.mrb[4].mxu1 }
 0x100   :  { %v1291_v54 = vpop.f32.mrb[5].mxu1 }
 0x101   :  { %v617_v55 = vpop.f32.mrb[6].mxu1 }
 0x102   :  { %v1292_v56 = vpop.f32.mrb[7].mxu1 }
 0x115   :  { %v1248_v57 = vpop.f32.mrb[4].mxu0 }
 0x116   :  { %v1249_v58 = vpop.f32.mrb[5].mxu0 }
 0x117   :  { %v1250_v59 = vadd.f32 %v1249_v58, %v1248_v57  ;;  %v1251_v60 = vpop.f32.mrb[6].mxu0 }
 0x118   :  { %v1252_v61 = vpop.f32.mrb[7].mxu0 }
 0x119   :  { %v574_v62 = vadd.f32 %v1250_v59, %v533_v50  ;;  %v1253_v63 = vadd.f32 %v1252_v61, %v1251_v60 }
 0x11b   :  { %v615_v0 = vadd.f32 %v614_v53, %v574_v62  ;;  %v577_v1 = vadd.f32 %v1253_v63, %v536_v52  ;;  %v1170_v52 = vld [vmem:[%s1811_s8] ss:$0 sm:$0xff] }
 0x11d   :  { %v618_v2 = vadd.f32 %v617_v55, %v577_v1  ;;  %v621_v3 = vmax.f32 %v615_v0, 0.0 }
 0x11f   :  { %v622_v4 = vmax.f32 %v618_v2, 0.0 }
 0x121   :  { %v623_v5 = vpack.c.bf16 %v622_v4, %v621_v3 }
 0x123   :  { %765 = vmatmul.mubr.bf16.vlgmr.msra.gmra.mrb[8].mxu1 %v623_v5 }
 0x124   :  { %1309 = vmatprep.mubr.msk.bf16.mxu1 %vm1414_vm0, %v1413_v43  ;;  %1294 = vmatpush3.bf16.msra.mxu1 %v1405_v11 }
 0x125   :  { %1295 = vmatprep.subr.bf16.mxu1 %v1413_v43 }
 0x128   :  { %1296 = vmatpush3.bf16.msra.mxu1 %v1406_v12 }
 0x129   :  { %1297 = vmatprep.subr.bf16.mxu1 %v1413_v43 }
 0x12c   :  { %1298 = vmatpush3.bf16.msra.mxu1 %v1407_v13 }
 0x12d   :  { %1299 = vmatprep.subr.bf16.mxu1 %v1413_v43 }
 0x130   :  { %1300 = vmatpush3.bf16.msra.mxu1 %v1408_v14 }
 0x131   :  { %1301 = vmatprep.subr.bf16.mxu1 %v1413_v43 }
 0x134   :  { %1302 = vmatpush3.bf16.msra.mxu1 %v1409_v15 }
 0x135   :  { %1303 = vmatprep.subr.bf16.mxu1 %v1413_v43 }
 0x138   :  { %1304 = vmatpush3.bf16.msra.mxu1 %v1410_v37 }
 0x139   :  { %1305 = vmatprep.subr.bf16.mxu1 %v1413_v43 }
 0x13c   :  { %1306 = vmatpush3.bf16.msra.mxu1 %v1411_v38 }
 0x13d   :  { %1307 = vmatprep.subr.bf16.mxu1 %v1413_v43 }
 0x140   :  { %1308 = vmatpush3.bf16.msra.mxu1 %v1412_v39 }
 0x1f6   :  { %v766_v23 = vpop.f32.mrb[8].mxu1 }
 0x1f7   :  { %v767_v24 = vadd.f32 %v766_v23, %v645_v21  ;;  %v768_v25 = vpop.f32.mrb[9].mxu1 }
 0x1f8   :  { %v769_v26 = vadd.f32 %v768_v25, %v649_v22  ;;  %v770_v27 = vpop.f32.mrb[10].mxu1 }
 0x1f9   :  { %v771_v28 = vadd.f32 %v770_v27, %v645_v21  ;;  %v772_v29 = vpop.f32.mrb[11].mxu1  ;;  %v775_v31 = vmax.f32 %v767_v24, 0.0 }
 0x1fa   :  { %v773_v30 = vadd.f32 %v772_v29, %v649_v22  ;;  %v776_v33 = vmax.f32 %v769_v26, 0.0 }
 0x1fb   :  { %v777_v32 = vmax.f32 %v771_v28, 0.0 }
 0x1fc   :  { %v778_v34 = vmax.f32 %v773_v30, 0.0 }
 0x1fd   :  { %v779_v35 = vpack.c.bf16 %v777_v32, %v775_v31 }
 0x1fe   :  { %v780_v36 = vpack.c.bf16 %v778_v34, %v776_v33 }
 0x200   :  { %948 = vmatprep.mubr.bf16.mxu0 %v780_v36 }
 0x201   :  { %949 = vmatmul.mubr.bf16.vlgmr.msra.gmra.mrb[8].mxu0 %v779_v35 }
 0x2d4   :  { %v1272_v40 = vpop.f32.mrb[8].mxu0 }
 0x2d5   :  { %v1273_v42 = vpop.f32.mrb[9].mxu0 }
 0x2d6   :  { %v1274_v44 = vadd.f32 %v1273_v42, %v1272_v40  ;;  %v1275_v45 = vpop.f32.mrb[10].mxu0 }
 0x2d7   :  { %v1276_v46 = vpop.f32.mrb[11].mxu0 }
 0x2d8   :  { %v951_v47 = vadd.f32 %v1274_v44, %v1153_v41  ;;  %v1277_v48 = vadd.f32 %v1276_v46, %v1275_v45 }
 0x2da   :  { %v954_v49 = vadd.f32 %v1277_v48, %v1153_v41  ;;  %v957_v50 = vmax.f32 %v951_v47, 0.0 }
 0x2dc   :  { %v958_v51 = vmax.f32 %v954_v49, 0.0 }
 0x2de   :  { %v959_v43 = vpack.c.bf16 %v958_v51, %v957_v50 }
 0x2e0   :  { %1310 = vmatmul.mubr.bf16.vlgmr.msra.gmra.mrb[12].mxu1 %v959_v43 }
 0x3b3   :  { %v1065_v53 = vpop.f32.mrb[12].mxu1 }
 0x3b4   :  { %v1311_v54 = vpop.f32.mrb[13].mxu1  ;;  %v1066_v56 = vadd.f32 %v1170_v52, %v1065_v53 }
 0x3b5   :  { %v1068_v55 = vpop.f32.mrb[14].mxu1 }
 0x3b6   :  { %v1069_v57 = vadd.f32 %v1170_v52, %v1068_v55  ;;  %v1312_v58 = vpop.f32.mrb[15].mxu1 }
 0x3b8   :  { %v1186_v59 = vpack.c.bf16 %v1069_v57, %v1066_v56 }
 0x3ba   :  { %1187 = vst [vmem:[%s1812_s9] sm:$0xff] %v1186_v59  }

</bundles_post_ra>
